<compile_context>
chip_gen: v5e
topology: v5e:2x2
jax: 0.10.0
libtpu: 0.0.40
codegen_flags: <defaults>
</compile_context>

<pallas_src>
import functools

import numpy as np
import jax
import jax.numpy as jnp
from jax import lax
from jax.experimental import pallas as pl
from jax.experimental.pallas import tpu as pltpu


def _cdiv(a, b):
    return -(-a // b)


def _round_up(x, m):
    return _cdiv(x, m) * m


def _inv_freq_f32(dim, base):
    """inv_freq as in the PyTorch reference (float64 intermediate, f32 result)."""
    return (1.0 / (base ** (np.arange(0, dim, 2, dtype=np.float64) / dim))).astype(
        np.float32)


def _choose_tiling(packed_rows, row_align, target_rows=2048):
    """Pick (block_rows, grid, padded_rows).

    * block_rows is a multiple of 2*row_align (the in-kernel half-block split
      stays sublane-aligned) and at most target_rows.
    * grid is always even and >= 2 (v7x megacore balance; harmless on v5e/v6e).
    * padded_rows = grid * block_rows >= packed_rows; padding is sliced off in
      the wrapper, so every seq_len gets big (8,128)-aligned tiles.
    """
    align = 2 * row_align
    block = min(target_rows, _round_up(max(1, _cdiv(packed_rows, 2)), align))
    block = max(block, align)
    grid = _cdiv(packed_rows, block)
    if grid % 2:
        grid += 1                                   # even split across 2 TCs
    block = _round_up(_cdiv(packed_rows, grid), align)   # shrink to limit padding
    return block, grid, grid * block


def _rope_kernel(consts_ref, cos_ref, sin_ref, *, block_rows):
    """Fill `block_rows` packed rows of the cos/sin tables per grid step.

    Packed row r holds positions (2r, 2r+1) side by side: lane j covers
    position 2r + (j >= dim) and frequency inv_freq[(j % dim) % (dim//2)],
    so every store is a full lane-dense (2*dim = 128) vst.

    EUP halving: cos/sin are computed only for rows [0, half); rows
    [half, block) have angles shifted by the per-lane constant 2*half*freq and
    are derived with the angle-addition identity (VPU only).
    """
    half = block_rows // 2
    lanes = cos_ref.shape[1]

    freq = consts_ref[0:1, :]      # inv_freq tiled over the 2*dim lanes
    parity = consts_ref[1:2, :]    # 0 for lanes < dim, 1 otherwise
    cos_d = consts_ref[2:3, :]     # cos(2*half*freq)
    sin_d = consts_ref[3:4, :]     # sin(2*half*freq)

    r0 = pl.program_id(0) * block_rows
    row = lax.broadcasted_iota(jnp.int32, (half, lanes), 0) + r0
    # Exact integer position then a single f32 multiply -> bit-identical to the
    # reference outer(t, inv_freq) for the directly-computed rows.
    t = (2 * row).astype(jnp.float32) + parity
    ang = t * freq
    cb = jnp.cos(ang)
    sb = jnp.sin(ang)
    # Rows shifted by `half` packed rows (= 2*half positions):
    # cos(a + d) = cos a cos d - sin a sin d ;  sin(a + d) = sin a cos d + cos a sin d
    c_hi = cb * cos_d - sb * sin_d
    s_hi = sb * cos_d + cb * sin_d

    cos_ref[0:half, :] = cb.astype(cos_ref.dtype)
    cos_ref[half:block_rows, :] = c_hi.astype(cos_ref.dtype)
    sin_ref[0:half, :] = sb.astype(sin_ref.dtype)
    sin_ref[half:block_rows, :] = s_hi.astype(sin_ref.dtype)


def llama_rotary_embedding(x, seq_len, *, dim, base=10000.0):
    """Returns (cos, sin) of shape (seq_len, dim) in x.dtype, matching
    PyTorch LlamaRotaryEmbedding.forward(x, seq_len=seq_len)."""
    assert dim % 2 == 0
    out_dtype = x.dtype
    itemsize = jnp.dtype(out_dtype).itemsize
    row_align = max(8, 32 // itemsize)          # 8 f32 / 16 bf16 / 32 int8-fp8

    lanes = 2 * dim
    packed_rows = (seq_len + 1) // 2            # 2 positions per packed row
    block_rows, grid, padded_rows = _choose_tiling(packed_rows, row_align)
    half = block_rows // 2

    # Per-lane constants (numpy, trace time): one tiny VMEM input, no per-step
    # recompute of inv_freq / parity inside the kernel.
    inv_freq = _inv_freq_f32(dim, base)                       # (dim//2,)
    lane_freq = np.tile(inv_freq, 4)                          # (2*dim,)
    lane_parity = np.repeat(np.arange(2, dtype=np.float32), dim)
    delta = 2.0 * half * lane_freq.astype(np.float64)
    consts = np.zeros((8, lanes), dtype=np.float32)
    consts[0] = lane_freq
    consts[1] = lane_parity
    consts[2] = np.cos(delta).astype(np.float32)
    consts[3] = np.sin(delta).astype(np.float32)
    consts = jnp.asarray(consts)

    kernel = functools.partial(_rope_kernel, block_rows=block_rows)

    cos_p, sin_p = pl.pallas_call(
        kernel,
        out_shape=(
            jax.ShapeDtypeStruct((padded_rows, lanes), out_dtype),
            jax.ShapeDtypeStruct((padded_rows, lanes), out_dtype),
        ),
        grid_spec=pltpu.PrefetchScalarGridSpec(
            num_scalar_prefetch=0,
            grid=(grid,),
            in_specs=[pl.BlockSpec((8, lanes), lambda i: (0, 0))],
            out_specs=(
                pl.BlockSpec((block_rows, lanes), lambda i: (i, 0)),
                pl.BlockSpec((block_rows, lanes), lambda i: (i, 0)),
            ),
        ),
        compiler_params=pltpu.CompilerParams(
            dimension_semantics=("parallel",)),
    )(consts)

    # Free row-major unpack back to (positions, dim); drop padding rows.
    cos = cos_p.reshape(2 * padded_rows, dim)[:seq_len]
    sin = sin_p.reshape(2 * padded_rows, dim)[:seq_len]
    return cos, sin


def _reference(seq_len, dim, base, dtype):
    inv_freq = jnp.asarray(_inv_freq_f32(dim, base))
    t = jnp.arange(seq_len, dtype=jnp.float32)
    freqs = jnp.outer(t, inv_freq)
    emb = jnp.concatenate([freqs, freqs], axis=-1)
    return jnp.cos(emb).astype(dtype), jnp.sin(emb).astype(dtype)


if __name__ == "__main__":
    # Module config: rotary dim 64, base 10000.  Odd, non-tile-multiple seq_len
    # exercises the padding + trailing-slice path.
    dim = 64
    base = 10000.0
    seq_len = 199

    # forward(x, seq_len) only uses x's dtype (torch default float32).
    key = jax.random.PRNGKey(0)
    x = jax.random.normal(key, (2, 4, seq_len, dim), dtype=jnp.float32)

    cos, sin = llama_rotary_embedding(x, seq_len, dim=dim, base=base)
    cos, sin = jax.block_until_ready((cos, sin))

    cos_ref, sin_ref = _reference(seq_len, dim, base, x.dtype)
    assert cos.shape == (seq_len, dim) and sin.shape == (seq_len, dim)
    assert cos.dtype == x.dtype and sin.dtype == x.dtype
    # Rows derived via the angle-addition identity differ from direct f32
    # evaluation by <= ~1 ulp of the angle (as noted in the review); 1e-4
    # tolerance covers it with large margin at these sequence lengths.
    assert jnp.allclose(cos, cos_ref, atol=1e-4, rtol=1e-4)
    assert jnp.allclose(sin, sin_ref, atol=1e-4, rtol=1e-4)

    print("KERNEL_OK")
</pallas_src>

<mosaic_0001>
module attributes {stable_mosaic.version = 11 : i64} {
  func.func @_rope_kernel(%arg0: i32, %arg1: memref<8x128xf32, #tpu.memory_space<vmem>>, %arg2: memref<64x128xf32, #tpu.memory_space<vmem>>, %arg3: memref<64x128xf32, #tpu.memory_space<vmem>>) attributes {dimension_semantics = [#tpu.dimension_semantics<parallel>], iteration_bounds = array<i64: 2>, scalar_prefetch = 0 : i64, scratch_operands = 0 : i64, tpu.core_type = #tpu.core_type<tc>, window_params = [{pipeline_mode = #tpu.pipeline_mode<synchronous>, transform_indices = @transform_0, window_bounds = array<i64: 8, 128>}, {transform_indices = @transform_1, window_bounds = array<i64: 64, 128>}, {transform_indices = @transform_2, window_bounds = array<i64: 64, 128>}]} {
    %c0 = arith.constant 0 : index
    %c0_0 = arith.constant 0 : index
    %0 = vector.load %arg1[%c0, %c0_0] : memref<8x128xf32, #tpu.memory_space<vmem>>, vector<1x128xf32>
    %c1 = arith.constant 1 : index
    %c0_1 = arith.constant 0 : index
    %1 = vector.load %arg1[%c1, %c0_1] : memref<8x128xf32, #tpu.memory_space<vmem>>, vector<1x128xf32>
    %c2 = arith.constant 2 : index
    %c0_2 = arith.constant 0 : index
    %2 = vector.load %arg1[%c2, %c0_2] : memref<8x128xf32, #tpu.memory_space<vmem>>, vector<1x128xf32>
    %c3 = arith.constant 3 : index
    %c0_3 = arith.constant 0 : index
    %3 = vector.load %arg1[%c3, %c0_3] : memref<8x128xf32, #tpu.memory_space<vmem>>, vector<1x128xf32>
    %c64_i32 = arith.constant 64 : i32
    %4 = arith.muli %arg0, %c64_i32 : i32
    %5 = tpu.iota {dimensions = array<i32: 0>} : vector<32x128xi32>
    %6 = vector.broadcast %4 : i32 to vector<32x128xi32>
    %7 = arith.addi %5, %6 : vector<32x128xi32>
    %c2_i32 = arith.constant 2 : i32
    %8 = vector.broadcast %c2_i32 : i32 to vector<32x128xi32>
    %9 = arith.muli %8, %7 : vector<32x128xi32>
    %10 = arith.sitofp %9 : vector<32x128xi32> to vector<32x128xf32>
    %11 = vector.broadcast %1 : vector<1x128xf32> to vector<32x128xf32>
    %12 = arith.addf %10, %11 : vector<32x128xf32>
    %13 = vector.broadcast %0 : vector<1x128xf32> to vector<32x128xf32>
    %14 = arith.mulf %12, %13 : vector<32x128xf32>
    %15 = math.cos %14 : vector<32x128xf32>
    %16 = math.sin %14 : vector<32x128xf32>
    %17 = vector.broadcast %2 : vector<1x128xf32> to vector<32x128xf32>
    %18 = arith.mulf %15, %17 : vector<32x128xf32>
    %19 = vector.broadcast %3 : vector<1x128xf32> to vector<32x128xf32>
    %20 = arith.mulf %16, %19 : vector<32x128xf32>
    %21 = arith.subf %18, %20 : vector<32x128xf32>
    %22 = vector.broadcast %2 : vector<1x128xf32> to vector<32x128xf32>
    %23 = arith.mulf %16, %22 : vector<32x128xf32>
    %24 = vector.broadcast %3 : vector<1x128xf32> to vector<32x128xf32>
    %25 = arith.mulf %15, %24 : vector<32x128xf32>
    %26 = arith.addf %23, %25 : vector<32x128xf32>
    %c0_4 = arith.constant 0 : index
    %c0_5 = arith.constant 0 : index
    %27 = vector.load %arg2[%c0_4, %c0_5] : memref<64x128xf32, #tpu.memory_space<vmem>>, vector<32x128xf32>
    tpu.vector_store %arg2[%c0_4, %c0_5], %15 {strides = array<i32>} : memref<64x128xf32, #tpu.memory_space<vmem>>, vector<32x128xf32>,
    %c32 = arith.constant 32 : index
    %c0_6 = arith.constant 0 : index
    %28 = vector.load %arg2[%c32, %c0_6] : memref<64x128xf32, #tpu.memory_space<vmem>>, vector<32x128xf32>
    tpu.vector_store %arg2[%c32, %c0_6], %21 {strides = array<i32>} : memref<64x128xf32, #tpu.memory_space<vmem>>, vector<32x128xf32>,
    %c0_7 = arith.constant 0 : index
    %c0_8 = arith.constant 0 : index
    %29 = vector.load %arg3[%c0_7, %c0_8] : memref<64x128xf32, #tpu.memory_space<vmem>>, vector<32x128xf32>
    tpu.vector_store %arg3[%c0_7, %c0_8], %16 {strides = array<i32>} : memref<64x128xf32, #tpu.memory_space<vmem>>, vector<32x128xf32>,
    %c32_9 = arith.constant 32 : index
    %c0_10 = arith.constant 0 : index
    %30 = vector.load %arg3[%c32_9, %c0_10] : memref<64x128xf32, #tpu.memory_space<vmem>>, vector<32x128xf32>
    tpu.vector_store %arg3[%c32_9, %c0_10], %26 {strides = array<i32>} : memref<64x128xf32, #tpu.memory_space<vmem>>, vector<32x128xf32>,
    return
  }
  func.func @transform_0(%arg0: i32) -> (i32, i32) {
    %c0_i32 = arith.constant 0 : i32
    %c0_i32_0 = arith.constant 0 : i32
    %c0_i32_1 = arith.constant 0 : i32
    return %c0_i32, %c0_i32_0 : i32, i32
  }
  func.func @transform_1(%arg0: i32) -> (i32, i32) {
    %c0_i32 = arith.constant 0 : i32
    %c0_i32_0 = arith.constant 0 : i32
    return %arg0, %c0_i32 : i32, i32
  }
  func.func @transform_2(%arg0: i32) -> (i32, i32) {
    %c0_i32 = arith.constant 0 : i32
    %c0_i32_0 = arith.constant 0 : i32
    return %arg0, %c0_i32 : i32, i32
  }
}

</mosaic_0001>

<bundles_post_ra>
// kernel: tpu_custom_call.1
= control target key start
LH: loop header
LB: loop body
LE: loop exit
PB: predicated region body
PF: predicated region fallthrough
CT: control target
= control target key end

     0   :  { %8 = vsyncpa [#allocation3], 0  ;;  %s2454_s0 = inlined_call_operand.hbm [shape: f32[8,128], index: 0, kind: input, shape index: {}]   ;;  %s2455_s1 = inlined_call_operand.hbm [shape: f32[128,128], index: 1, kind: output, shape index: {0}]   ;;  %s2456_s2 = inlined_call_operand.hbm [shape: f32[128,128], index: 2, kind: output, shape index: {1}]  }
   0x1   :  { %9 = vsyncpa [#allocation4], 0 }
   0x2   :  { %11 = vsyncpa [#allocation4 + $0x1], 0 }
   0x3   :  { %12 = vsyncpa [#allocation7], 0 }
   0x4   :  { %14 = vsyncpa [#allocation7 + $0x1], 0  ;;  %s1859_s9 = smov 0   ;;  %s1861_s10 = smov 0  }
   0x5   :  { %s1863_s11 = smov 0   ;;  %s1865_s12 = smov 0  }
   0x6 LB: > { %s1593_s13 = sadd.s32 4294967295, %s1832_s12   ;;  %s1594_s14 = sadd.s32 4294967294, %s1832_s12   ;;  %s1832_s12 = sphi %s1865_s12, %s2468_s12   ;;  %s1828_s11 = sphi %s1863_s11, %s2467_s11   ;;  %s1824_s10 = sphi %s1861_s10, %s2466_s10   ;;  %s1820_s9 = sphi %s1859_s9, %s2465_s9  }
   0x7   : > { %s1882_s15 = sadd.s32 1, %s1832_s12   ;;  %s48_s16 = sadd.s32 1, %s1828_s11 }
   0x8   : > { %s45_s17 = ssub.s32 %s1832_s12, %s1882_s15  ;;  %p58_p0 = scmp.ne.s32.totalorder %s1828_s11, %s1824_s10 }
   0x9   : > { %p46_p1 = scmp.eq.s32.totalorder %s45_s17, 0  ;;  %p59_p2 = scmp.eq.s32.totalorder %s1593_s13, 1 }
   0xa   : > { %p64_p3 = scmp.ne.s32.totalorder %s1824_s10, %s1820_s9  ;;  %p65_p4 = scmp.eq.s32.totalorder %s1594_s14, 1 }
   0xb   : > { %s1892_s18 = scalar_select %p46_p1, %s1828_s11, %s48_s16  }
   0xc   : > { %p1894_p5 = por %p59_p2, %p58_p0  ;;  %p1898_p6 = por %p65_p4, %p64_p3 }
   0xd   : > { %p1595_p7 = scmp.ge.s32.totalorder %s1832_s12, 1  ;;  %p98_p8 = scmp.lt.s32.totalorder %s1832_s12, 3 }
   0xe   : > { %p1655_p9 = scmp.eq.s32.totalorder %s1593_s13, 0  ;;  %s110_s23 = sshll.u32 %s2454_s0, 4  ;;  %s111_s23 = int_to_ptr.hbm [resolvable:$true] %s110_s23 }
   0xf   : > { %p99_p10 = pnand %p1595_p7, %p98_p8  ;;  %s1834_s24 = smov [#allocation2]  }
  0x10   : > { %s112_s25 = sshll.u32 %s1834_s24, 4  ;;  %s113_s25 = int_to_ptr.vmem [resolvable:$true] %s112_s25 }
  0x11   : > { %p1644_p11 = pneg %p99_p10  ;;  %125 = sbr.rel (%p99_p10) target bundleno = 262 (0x106), region = 24 }
  0x13   : > { %p1645_p12 = pnand %p1655_p9, %p1644_p11 }
  0x15   : > { %1647 = dma.hbm_to_vmem [thread:$0]  (!%p1645_p12), %s111_s23, 128, %s113_s25, [#allocation3]  }
  0x16   : > { %1807 = dma.done.wait (%p1655_p9), [#allocation3], 128  }
  0x17   : > { %1809 = vsyncadd (%p1655_p9), [#allocation3], 4294967168  ;;  %s1907_s26 = sshll.u32 %s1593_s13, 6  ;;  %v155_v0 = vlaneseq  ;;  %v1920_v10 = vld [vmem:[#allocation2 + $0x1] ss:$0 sm:$0xff]  ;;  %s2193_s27 = sand.u32 1, %s1824_s10  }
  0x18   : > { %v1910_v1 = vstv %s1907_s26  ;;  %v1922_v11 = vld [vmem:[#allocation2] ss:$0 sm:$0xff]  ;;  %v1835_v44 = vmov 683565275   ;;  %v1836_v46 = vmov 2475754826   ;;  %s1478_s5 = scalar_lea.hbm %s2455_s1, %s1907_s26  ;;  %s1495_s8 = scalar_lea.hbm %s2456_s2, %s1907_s26 }
  0x19   : > { %v1912_v2 = vshrl.u32 %v155_v0, 7  ;;  %v1837_v48 = vmov 2131351028   ;;  %v1838_v50 = vmov 2102212464   ;;  %s1599_s28 = sshll.u32 %s2193_s27, 6 }
  0x1a   : > { %v1839_v52 = vmov 920167782   ;;  %v1840_v59 = vmov 1326507024   ;;  %s2240_s29 = scalar_lea.vmem [#allocation5], %s1599_s28  ;;  %s2249_s30 = scalar_lea.vmem [#allocation6], %s1599_s28 }
  0x1b   : > { %v161_v3 = vadd.s32 %v1910_v1, %v1912_v2  ;;  %v157_v4 = vadd.s32 8, %v1912_v2  ;;  %v158_v5 = vadd.s32 16, %v1912_v2  ;;  %s1479_s13 = sshll.u32 %s2240_s29, 4  ;;  %s2393_s14 = sshll.u32 %s1478_s5, 4  ;;  %s1480_s13 = int_to_ptr.vmem [resolvable:$true] %s1479_s13  ;;  %s1482_s14 = int_to_ptr.hbm [resolvable:$true] %s2393_s14 }
  0x1c   : > { %s2400_s16 = sshll.u32 %s1495_s8, 4  ;;  %s1496_s17 = sshll.u32 %s2249_s30, 4  ;;  %s1499_s16 = int_to_ptr.hbm [resolvable:$true] %s2400_s16  ;;  %s2407_s17 = int_to_ptr.vmem [resolvable:$true] %s1496_s17 }
  0x1d   : > { %v165_v6 = vmul.u32 2, %v161_v3  ;;  %v162_v7 = vadd.s32 %v1910_v1, %v157_v4  ;;  %v163_v8 = vadd.s32 %v1910_v1, %v158_v5  ;;  %s1462_s21 = scalar_lea.sflag [#allocation4], %s2193_s27  ;;  %s1748_s22 = sshra.s32 %s1482_s14, 4  ;;  %s1749_s22 = int_to_ptr.hbm [resolvable:$true] %s1748_s22 }
  0x1e   : > { %s1750_s23 = scalar_lea.hbm %s1749_s22, 64  ;;  %s1754_s26 = scalar_lea.hbm %s2455_s1, 128 }
  0x1f   : > { %v169_v9 = vcvt.s32.f32 %v165_v6  ;;  %v166_v12 = vmul.u32 2, %v162_v7  ;;  %v167_v13 = vmul.u32 2, %v163_v8  ;;  %p1751_p13 = scmp.ne.s32.totalorder %s1749_s22, %s1750_s23  ;;  %p1755_p2 = scmp.lt.s32.totalorder %s1749_s22, %s2455_s1 }
  0x20   : > { %p1756_p3 = scmp.lt.s32.totalorder %s1754_s26, %s1750_s23 }
  0x21   : > { %v174_v14 = vadd.f32 %v1920_v10, %v169_v9  ;;  %v170_v15 = vcvt.s32.f32 %v166_v12  ;;  %v171_v16 = vcvt.s32.f32 %v167_v13  ;;  %p1752_p0 = pnand %p1751_p13, %p1894_p5 }
  0x22   : > { %p1757_p4 = por %p1756_p3, %p1755_p2 }
  0x23   : > { %v1926_v17 = vmul.f32 %v1922_v11, %v174_v14  ;;  %v175_v18 = vadd.f32 %v1920_v10, %v170_v15  ;;  %v176_v19 = vadd.f32 %v1920_v10, %v171_v16  ;;  %p1753_p1 = pneg %p1752_p0 }
  0x25   : > { %v183_v20 = vand.u32 2147483647, %v1926_v17  ;;  %v186_v21 = vand.u32 2139095040, %v1926_v17  ;;  %v1933_v22 = vmul.f32 %v1922_v11, %v175_v18  ;;  %v1940_v27 = vmul.f32 %v1922_v11, %v176_v19  ;;  %p1758_p7 = pnand %p1757_p4, %p1753_p1 }
  0x27   : > { %v187_v23 = vshrl.u32 %v186_v21, 23  ;;  %v190_v24 = vand.u32 8388607, %v183_v20  ;;  %v337_v25 = vand.u32 2147483647, %v1933_v22  ;;  %v340_v26 = vand.u32 2139095040, %v1933_v22 }
  0x28   : > { %v494_v35 = vand.u32 2139095040, %v1940_v27 }
  0x29   : > { %v1602_v28 = vadd.s32 4294967169, %v187_v23  ;;  %v191_v29 = vor.u32 8388608, %v190_v24  ;;  %v341_v30 = vshrl.u32 %v340_v26, 23  ;;  %v344_v34 = vand.u32 8388607, %v337_v25 }
  0x2a   : > { %v1950_v42 = vshrl.u32 %v494_v35, 23 }
  0x2b   : > { %v193_v31 = vadd.s32 1, %v1602_v28  ;;  %v1942_v32 = vshll.u32 %v191_v29, 8  ;;  %v1605_v33 = vadd.s32 4294967169, %v341_v30  ;;  %v345_v41 = vor.u32 8388608, %v344_v34 }
  0x2d   : > { %vm194_vm0 = vcmp.gt.s32.totalorder %v193_v31, 0  ;;  %v347_v37 = vadd.s32 1, %v1605_v33  ;;  %v1948_v40 = vand.u32 65535, %v1942_v32  ;;  %v233_v19 = vshrl.u32 %v1942_v32, 16 }
  0x2e   : > { %v195_v36 = vsel %vm194_vm0, %v193_v31, 0  ;;  %v1972_v21 = vshll.u32 %v345_v41, 8 }
  0x2f   : > { %v196_v38 = vshrl.u32 %v195_v36, 5  ;;  %v197_v39 = vand.u32 31, %v195_v36  ;;  %vm348_vm2 = vcmp.gt.s32.totalorder %v347_v37, 0 }
  0x30   : > { %v349_v0 = vsel %vm348_vm2, %v347_v37, 0 }
  0x31   : > { %v198_v43 = vsub.s32 32, %v197_v39  ;;  %v200_v45 = vshll.u32 %v1835_v44, %v197_v39  ;;  %v203_v47 = vshll.u32 %v1836_v46, %v197_v39  ;;  %v206_v49 = vshll.u32 %v1837_v48, %v197_v39 }
  0x32   : > { %v209_v51 = vshll.u32 %v1838_v50, %v197_v39  ;;  %v212_v53 = vshll.u32 %v1839_v52, %v197_v39  ;;  %vm215_vm1 = vcmp.lt.s32.totalorder %v196_v38, 1  ;;  %vm216_vm3 = vcmp.lt.s32.totalorder %v196_v38, 2 }
  0x33   : > { %v199_v54 = vshrl.u32 %v1835_v44, %v198_v43  ;;  %v201_v55 = vshrl.u32 %v1836_v46, %v198_v43  ;;  %v204_v56 = vshrl.u32 %v1837_v48, %v198_v43  ;;  %v207_v57 = vshrl.u32 %v1838_v50, %v198_v43 }
  0x34   : > { %v210_v58 = vshrl.u32 %v1839_v52, %v198_v43  ;;  %v213_v60 = vshrl.u32 %v1840_v59, %v198_v43  ;;  %vm218_vm4 = vcmp.lt.s32.totalorder %v196_v38, 4  ;;  %vm217_vm5 = vcmp.lt.s32.totalorder %v196_v38, 3 }
  0x35   : > { %v202_v61 = vor.u32 %v201_v55, %v200_v45  ;;  %v205_v62 = vor.u32 %v204_v56, %v203_v47  ;;  %v208_v63 = vor.u32 %v207_v57, %v206_v49  ;;  %v1963_v5 = vand.u32 31, %v349_v0 }
  0x36   : > { %v211_v3 = vor.u32 %v210_v58, %v209_v51  ;;  %v214_v4 = vor.u32 %v213_v60, %v212_v53  ;;  %v1979_v28 = vshrl.u32 %v349_v0, 5 }
  0x37   : > { %v219_v6 = vsel %vm215_vm1, %v199_v54, %v202_v61  ;;  %v220_v7 = vsel %vm218_vm4, %v208_v63, 2102212464  ;;  %v223_v8 = vsel %vm215_vm1, %v202_v61, %v205_v62  ;;  %v227_v9 = vsel %vm215_vm1, %v205_v62, %v208_v63 }
  0x38   : > { %v221_v12 = vsel %vm217_vm5, %v205_v62, %v220_v7  ;;  %v224_v13 = vsel %vm218_vm4, %v211_v3, 920167782  ;;  %v228_v14 = vsel %vm218_vm4, %v214_v4, 1326507024  ;;  %v1969_v15 = vsub.s32 32, %v1963_v5 }
  0x39   : > { %v225_v16 = vsel %vm217_vm5, %v208_v63, %v224_v13  ;;  %v229_v18 = vsel %vm217_vm5, %v211_v3, %v228_v14  ;;  %v1975_v23 = vsel %vm216_vm3, %v219_v6, %v221_v12  ;;  %v354_v34 = vshll.u32 %v1835_v44, %v1963_v5 }
  0x3a   : > { %v226_v24 = vsel %vm216_vm3, %v223_v8, %v225_v16  ;;  %v230_v26 = vsel %vm216_vm3, %v227_v9, %v229_v18  ;;  %v355_v35 = vshrl.u32 %v1836_v46, %v1969_v15  ;;  %v357_v36 = vshll.u32 %v1836_v46, %v1963_v5 }
  0x3b   : > { %v234_v29 = vand.u32 65535, %v230_v26  ;;  %v235_v30 = vshrl.u32 %v230_v26, 16  ;;  %v256_v31 = vand.u32 65535, %v226_v24  ;;  %v257_v33 = vshrl.u32 %v226_v24, 16 }
  0x3c   : > { %v358_v37 = vshrl.u32 %v1837_v48, %v1969_v15  ;;  %v360_v43 = vshll.u32 %v1837_v48, %v1963_v5  ;;  %v1995_v0 = vor.u32 %v355_v35, %v354_v34  ;;  %v1841_v3 = vmov 0  }
  0x3d   : > { %v236_v38 = vmul.u32 %v234_v29, %v1948_v40  ;;  %v237_v39 = vmul.u32 %v235_v30, %v1948_v40  ;;  %v238_v41 = vmul.u32 %v234_v29, %v233_v19  ;;  %v239_v45 = vmul.u32 %v235_v30, %v233_v19 }
  0x3e   : > { %v258_v47 = vmul.u32 %v256_v31, %v1948_v40  ;;  %v259_v49 = vmul.u32 %v257_v33, %v1948_v40  ;;  %v260_v51 = vmul.u32 %v256_v31, %v233_v19  ;;  %v261_v56 = vmul.u32 %v257_v33, %v233_v19 }
  0x3f   : > { %v240_v53 = vshll.u32 %v237_v39, 16  ;;  %v241_v54 = vshrl.u32 %v237_v39, 16  ;;  %v242_v55 = vshll.u32 %v238_v41, 16  ;;  %v243_v57 = vshrl.u32 %v238_v41, 16 }
  0x40   : > { %v262_v58 = vshll.u32 %v259_v49, 16  ;;  %v263_v60 = vshrl.u32 %v259_v49, 16  ;;  %v264_v61 = vshll.u32 %v260_v51, 16  ;;  %v265_v63 = vshrl.u32 %v260_v51, 16 }
  0x41   : > { %vm244_vm6 = vc.u32 %v236_v38, %v240_v53  ;;  %v246_v62 = vadd.s32 %v240_v53, %v236_v38  ;;  %v361_v40 = vshrl.u32 %v1838_v50, %v1969_v15  ;;  %v363_v9 = vshll.u32 %v1838_v50, %v1963_v5 }
  0x42   : > { %v245_v4 = vsel %vm244_vm6, 1, %v1841_v3  ;;  %vm266_vm7 = vc.u32 %v258_v47, %v262_v58  ;;  %v268_v6 = vadd.s32 %v262_v58, %v258_v47  ;;  %v2004_v14 = vor.u32 %v358_v37, %v357_v36 }
  0x43   : > { %v247_v7 = vadd.s32 %v245_v4, %v239_v45  ;;  %vm248_vm8 = vc.u32 %v246_v62, %v242_v55  ;;  %v267_v8 = vsel %vm266_vm7, 1, %v1841_v3  ;;  %v362_v19 = vor.u32 %v361_v40, %v360_v43 }
  0x44   : > { %v249_v12 = vsel %vm248_vm8, 1, %v1841_v3  ;;  %v269_v13 = vadd.s32 %v267_v8, %v261_v56  ;;  %vm270_vm9 = vc.u32 %v268_v6, %v264_v61  ;;  %v364_v24 = vshrl.u32 %v1839_v52, %v1969_v15 }
  0x45   : > { %v251_v16 = vadd.s32 %v249_v12, %v247_v7  ;;  %v271_v18 = vsel %vm270_vm9, 1, %v1841_v3  ;;  %v366_v29 = vshll.u32 %v1839_v52, %v1963_v5  ;;  %v367_v30 = vshrl.u32 %v1840_v59, %v1969_v15 }
  0x46   : > { %v273_v26 = vadd.s32 %v271_v18, %v269_v13  ;;  %vm369_vm10 = vcmp.lt.s32.totalorder %v1979_v28, 1  ;;  %v2014_v33 = vadd.s32 %v268_v6, %v264_v61  ;;  %v365_v34 = vor.u32 %v364_v24, %v363_v9 }
  0x47   : > { %v252_v31 = vadd.s32 %v251_v16, %v241_v54  ;;  %vm371_vm11 = vcmp.lt.s32.totalorder %v1979_v28, 3  ;;  %v368_v36 = vor.u32 %v367_v30, %v366_v29  ;;  %vm370_vm12 = vcmp.lt.s32.totalorder %v1979_v28, 2 }
  0x48   : > { %v274_v35 = vadd.s32 %v273_v26, %v263_v60  ;;  %vm372_vm13 = vcmp.lt.s32.totalorder %v1979_v28, 4  ;;  %v377_v5 = vsel %vm369_vm10, %v1995_v0, %v2004_v14  ;;  %v1608_v39 = vadd.s32 4294967169, %v1950_v42 }
  0x49   : > { %v2019_v37 = vadd.s32 %v252_v31, %v243_v57  ;;  %v378_v38 = vsel %vm372_vm13, %v365_v34, 920167782  ;;  %v386_v45 = vand.u32 65535, %v1972_v21  ;;  %v387_v47 = vshrl.u32 %v1972_v21, 16 }
  0x4a   : > { %v275_v41 = vadd.s32 %v274_v35, %v265_v63  ;;  %v379_v43 = vsel %vm371_vm11, %v362_v19, %v378_v38  ;;  %v276_v49 = vmul.u32 %v1942_v32, %v1975_v23  ;;  %v381_v42 = vsel %vm369_vm10, %v2004_v14, %v362_v19 }
  0x4b   : > { %vm278_vm14 = vc.u32 %v2019_v37, %v2014_v33  ;;  %v380_v51 = vsel %vm370_vm12, %v377_v5, %v379_v43  ;;  %v382_v54 = vsel %vm372_vm13, %v368_v36, 1326507024  ;;  %v501_v32 = vadd.s32 1, %v1608_v39 }
  0x4c   : > { %v279_v53 = vadd.s32 1, %v275_v41  ;;  %v410_v55 = vand.u32 65535, %v380_v51  ;;  %v411_v56 = vshrl.u32 %v380_v51, 16  ;;  %v383_v57 = vsel %vm371_vm11, %v365_v34, %v382_v54 }
  0x4d   : > { %v384_v58 = vsel %vm370_vm12, %v381_v42, %v383_v57  ;;  %v491_v7 = vand.u32 2147483647, %v1940_v27  ;;  %vm502_vm15 = vcmp.gt.s32.totalorder %v501_v32, 0  ;;  %v353_v13 = vshrl.u32 %v1835_v44, %v1969_v15 }
  0x4e   : > { %v280_v23 = vsel %vm278_vm14, %v279_v53, %v275_v41  ;;  %v412_v60 = vmul.u32 %v410_v55, %v386_v45  ;;  %v413_v61 = vmul.u32 %v411_v56, %v386_v45  ;;  %v388_v63 = vand.u32 65535, %v384_v58 }
  0x4f   : > { %v281_v62 = vadd.s32 %v280_v23, %v276_v49  ;;  %v389_v4 = vshrl.u32 %v384_v58, 16  ;;  %v414_v6 = vmul.u32 %v410_v55, %v387_v47  ;;  %v415_v18 = vmul.u32 %v411_v56, %v387_v47 }
  0x50   : > { %v416_v40 = vshll.u32 %v413_v61, 16  ;;  %v390_v9 = vmul.u32 %v388_v63, %v386_v45  ;;  %v392_v16 = vmul.u32 %v388_v63, %v387_v47  ;;  %v374_v31 = vsel %vm372_vm13, %v362_v19, 2102212464 }
  0x51   : > { %v282_v8 = vadd.s32 536870912, %v281_v62  ;;  %v391_v12 = vmul.u32 %v389_v4, %v386_v45  ;;  %v418_v24 = vshll.u32 %v414_v6, 16  ;;  %v393_v29 = vmul.u32 %v389_v4, %v387_v47 }
  0x52   : > { %vm420_vm0 = vc.u32 %v412_v60, %v416_v40  ;;  %v396_v34 = vshll.u32 %v392_v16, 16  ;;  %v422_v36 = vadd.s32 %v416_v40, %v412_v60  ;;  %v503_v15 = vsel %vm502_vm15, %v501_v32, 0 }
  0x53   : > { %v2050_v26 = vshrl.u32 %v282_v8, 30  ;;  %v394_v30 = vshll.u32 %v391_v12, 16  ;;  %v421_v35 = vsel %vm420_vm0, 1, %v1841_v3  ;;  %v417_v41 = vshrl.u32 %v413_v61, 16 }
  0x54   : > { %v423_v43 = vadd.s32 %v421_v35, %v415_v18  ;;  %vm424_vm2 = vc.u32 %v422_v36, %v418_v24  ;;  %v395_v47 = vshrl.u32 %v391_v12, 16  ;;  %v397_v19 = vshrl.u32 %v392_v16, 16 }
  0x55   : > { %v284_v5 = vshll.u32 %v2050_v26, 30  ;;  %vm398_vm1 = vc.u32 %v390_v9, %v394_v30  ;;  %v400_v38 = vadd.s32 %v394_v30, %v390_v9  ;;  %v419_v42 = vshrl.u32 %v414_v6, 16 }
  0x56   : > { %v399_v39 = vsel %vm398_vm1, 1, %v1841_v3  ;;  %v425_v53 = vsel %vm424_vm2, 1, %v1841_v3  ;;  %v373_v57 = vsel %vm369_vm10, %v353_v13, %v1995_v0  ;;  %v375_v32 = vsel %vm371_vm11, %v2004_v14, %v374_v31 }
  0x57   : > { %v285_v45 = vsub.s32 %v281_v62, %v284_v5  ;;  %v401_v49 = vadd.s32 %v399_v39, %v393_v29  ;;  %vm402_vm3 = vc.u32 %v400_v38, %v396_v34  ;;  %v427_v56 = vadd.s32 %v425_v53, %v423_v43 }
  0x58   : > { %v403_v51 = vsel %vm402_vm3, 1, %v1841_v3  ;;  %v2066_v23 = vadd.s32 %v422_v36, %v418_v24  ;;  %v505_v62 = vand.u32 31, %v503_v15  ;;  %v376_v4 = vsel %vm370_vm12, %v373_v57, %v375_v32 }
  0x59   : > { %vm286_vm4 = vcmp.lt.s32.totalorder %v285_v45, 0  ;;  %v287_v54 = vsub.s32 0, %v285_v45  ;;  %v405_v55 = vadd.s32 %v403_v51, %v401_v49  ;;  %v428_v61 = vadd.s32 %v427_v56, %v417_v41 }
  0x5a   : > { %v498_v0 = vand.u32 8388607, %v491_v7  ;;  %v506_v9 = vsub.s32 32, %v505_v62  ;;  %vm185_vm6 = vcmp.lt.s32.totalorder %v1926_v17, 0  ;;  %v277_v12 = vadd.s32 %v2014_v33, %v2019_v37 }
  0x5b   : > { %v288_v58 = vsel %vm286_vm4, %v287_v54, %v285_v45  ;;  %v406_v60 = vadd.s32 %v405_v55, %v395_v47  ;;  %v429_v40 = vadd.s32 %v428_v61, %v419_v42  ;;  %v430_v28 = vmul.u32 %v1972_v21, %v376_v4 }
  0x5c   : > { %v289_v63 = vclz %v288_v58  ;;  %v307_v16 = vsub.s32 4, %v2050_v26  ;;  %v499_v24 = vor.u32 8388608, %v498_v0  ;;  %v2081_v34 = vshrl.u32 %v503_v15, 5 }
  0x5d   : > { %v2070_v6 = vadd.s32 %v406_v60, %v397_v19  ;;  %v433_v14 = vadd.s32 1, %v429_v40  ;;  %vm2085_vm8 = vcmp.le.f32.partialorder %v183_v20, 0.7853982  ;;  %v511_v33 = vshll.u32 %v1836_v46, %v505_v62 }
  0x5e   : > { %v1603_v8 = vadd.s32 4294967294, %v289_v63  ;;  %v512_v21 = vshrl.u32 %v1837_v48, %v506_v9  ;;  %v514_v37 = vshll.u32 %v1837_v48, %v505_v62  ;;  %v517_v36 = vshll.u32 %v1838_v50, %v505_v62 }
  0x5f   : > { %vm432_vm5 = vc.u32 %v2070_v6, %v2066_v23  ;;  %v508_v15 = vshll.u32 %v1835_v44, %v505_v62  ;;  %v509_v41 = vshrl.u32 %v1836_v46, %v506_v9  ;;  %v515_v20 = vshrl.u32 %v1838_v50, %v506_v9 }
  0x60   : > { %vm1604_vm7 = vcmp.lt.s32.totalorder %v1603_v8, 0  ;;  %v434_v18 = vsel %vm432_vm5, %v433_v14, %v429_v40  ;;  %v518_v43 = vshrl.u32 %v1839_v52, %v506_v9  ;;  %vm526_vm9 = vcmp.lt.s32.totalorder %v2081_v34, 4 }
  0x61   : > { %v292_v13 = vsel %vm1604_vm7, 0, %v1603_v8  ;;  %v435_v39 = vadd.s32 %v434_v18, %v430_v28  ;;  %v513_v51 = vor.u32 %v512_v21, %v511_v33  ;;  %v516_v42 = vor.u32 %v515_v20, %v514_v37 }
  0x62   : > { %v293_v29 = vsub.s32 32, %v292_v13  ;;  %v294_v30 = vshll.u32 %v285_v45, %v292_v13  ;;  %v297_v31 = vsub.s32 4294967266, %v292_v13  ;;  %v520_v45 = vshll.u32 %v1839_v52, %v505_v62 }
  0x63   : > { %v436_v19 = vadd.s32 536870912, %v435_v39  ;;  %v519_v53 = vor.u32 %v518_v43, %v517_v36  ;;  %v521_v54 = vshrl.u32 %v1840_v59, %v506_v9  ;;  %vm523_vm10 = vcmp.lt.s32.totalorder %v2081_v34, 1 }
  0x64   : > { %v295_v5 = vshrl.u32 %v277_v12, %v293_v29  ;;  %v298_v38 = vadd.s32 127, %v297_v31  ;;  %v308_v32 = vsel %vm185_vm6, %v307_v16, %v2050_v26  ;;  %v510_v58 = vor.u32 %v509_v41, %v508_v15 }
  0x65   : > { %v437_v57 = vshrl.u32 %v436_v19, 30  ;;  %v522_v60 = vor.u32 %v521_v54, %v520_v45  ;;  %v2104_v61 = vshll.u32 %v499_v24, 8  ;;  %vm525_vm11 = vcmp.lt.s32.totalorder %v2081_v34, 3 }
  0x66   : > { %v296_v47 = vor.u32 %v295_v5, %v294_v30  ;;  %v299_v49 = vshll.u32 %v298_v38, 23  ;;  %v532_v4 = vsel %vm526_vm9, %v519_v53, 920167782  ;;  %vm339_vm12 = vcmp.lt.s32.totalorder %v1933_v22, 0 }
  0x67   : > { %v438_v63 = vshll.u32 %v437_v57, 30  ;;  %vm524_vm13 = vcmp.lt.s32.totalorder %v2081_v34, 2  ;;  %v535_v40 = vsel %vm523_vm10, %v513_v51, %v516_v42  ;;  %v536_v26 = vsel %vm526_vm9, %v522_v60, 1326507024 }
  0x68   : > { %v300_v55 = vor.u32 4788187, %v299_v49  ;;  %v303_v56 = vcvt.s32.f32 %v296_v47  ;;  %v310_v8 = vsel %vm2085_vm8, 0, %v308_v32  ;;  %v507_v12 = vshrl.u32 %v1835_v44, %v506_v9 }
  0x69   : > { %v2117_v14 = vsub.s32 %v435_v39, %v438_v63  ;;  %v531_v28 = vsel %vm523_vm10, %v510_v58, %v513_v51  ;;  %v533_v13 = vsel %vm525_vm11, %v516_v42, %v532_v4  ;;  %v537_v16 = vsel %vm525_vm11, %v519_v53, %v536_v26 }
  0x6a   : > { %v301_v62 = vand.u32 2147483647, %v300_v55  ;;  %v540_v18 = vand.u32 65535, %v2104_v61  ;;  %v538_v30 = vsel %vm524_vm13, %v535_v40, %v537_v16  ;;  %v943_v9 = vadd.s32 3, %v310_v8 }
  0x6b   : > { %vm440_vm14 = vcmp.lt.s32.totalorder %v2117_v14, 0  ;;  %v441_v29 = vsub.s32 0, %v2117_v14  ;;  %v461_v31 = vsub.s32 4, %v437_v57  ;;  %v528_v33 = vsel %vm526_vm9, %v516_v42, 2102212464 }
  0x6c   : > { %v304_v0 = vmul.f32 %v303_v56, %v301_v62  ;;  %v543_v21 = vshrl.u32 %v538_v30, 16  ;;  %v534_v5 = vsel %vm524_vm13, %v531_v28, %v533_v13  ;;  %v541_v38 = vshrl.u32 %v2104_v61, 16 }
  0x6d   : > { %v442_v36 = vsel %vm440_vm14, %v441_v29, %v2117_v14  ;;  %v542_v41 = vand.u32 65535, %v538_v30  ;;  %v564_v20 = vand.u32 65535, %v534_v5  ;;  %v2146_v45 = vand.u32 3, %v310_v8 }
  0x6e   : > { %v305_v24 = vxor.u32 2147483648, %v304_v0  ;;  %v443_v15 = vclz %v442_v36  ;;  %v431_v47 = vadd.s32 %v2066_v23, %v2070_v6  ;;  %v2150_v49 = vmul.u32 %v543_v21, %v540_v18 }
  0x6f   : > { %v2152_v19 = vand.u32 3, %v943_v9  ;;  %v2156_v35 = vsel %vm523_vm10, %v507_v12, %v510_v58  ;;  %v2160_v53 = vsel %vm525_vm11, %v513_v51, %v528_v33  ;;  %v2164_v56 = vsel %vm339_vm12, %v461_v31, %v437_v57 }
  0x70   : > { %v306_v37 = vsel %vm185_vm6, %v305_v24, %v304_v0  ;;  %v1606_v42 = vadd.s32 4294967294, %v443_v15  ;;  %v565_v23 = vshrl.u32 %v534_v5, 16  ;;  %v544_v6 = vmul.u32 %v542_v41, %v540_v18 }
  0x71   : > { %v2142_v39 = vsel %vm2085_vm8, %v1926_v17, %v306_v37  ;;  %v2166_v32 = vmul.u32 %v542_v41, %v541_v38  ;;  %v566_v60 = vmul.u32 %v564_v20, %v540_v18  ;;  %v548_v4 = vshll.u32 %v2150_v49, 16 }
  0x72   : > { %v311_v43 = vmul.f32 %v2142_v39, %v2142_v39  ;;  %vm1607_vm15 = vcmp.lt.s32.totalorder %v1606_v42, 0  ;;  %vm332_vm0 = vcmp.eq.s32.totalorder %v2146_v45, 2  ;;  %vm949_vm1 = vcmp.eq.s32.totalorder %v2152_v19, 2 }
  0x73   : > { %v446_v58 = vsel %vm1607_vm15, 0, %v1606_v42  ;;  %v2172_v26 = vmul.u32 %v564_v20, %v541_v38  ;;  %v547_v12 = vmul.u32 %v543_v21, %v541_v38  ;;  %v2174_v28 = vmul.u32 %v565_v23, %v540_v18 }
  0x74   : > { %v312_v54 = vmul.f32 -0.001358992, %v311_v43  ;;  %v319_v55 = vmul.f32 -0.00019511016, %v311_v43  ;;  %v447_v51 = vsub.s32 32, %v446_v58  ;;  %v448_v40 = vshll.u32 %v2117_v14, %v446_v58 }
  0x75   : > { %v451_v57 = vsub.s32 4294967266, %v446_v58  ;;  %vm329_vm2 = vcmp.eq.s32.totalorder %v2146_v45, 0  ;;  %vm946_vm3 = vcmp.eq.s32.totalorder %v2152_v19, 0  ;;  %v549_v24 = vshrl.u32 %v2150_v49, 16 }
  0x76   : > { %v313_v62 = vadd.f32 0.041655596, %v312_v54  ;;  %v320_v63 = vadd.f32 0.008332121, %v319_v55  ;;  %v449_v13 = vshrl.u32 %v431_v47, %v447_v51  ;;  %v550_v29 = vshll.u32 %v2166_v32, 16 }
  0x77   : > { %v452_v16 = vadd.s32 127, %v451_v57  ;;  %vm328_vm4 = vcmp.lt.s32.totalorder %v2146_v45, 2  ;;  %vm945_vm5 = vcmp.lt.s32.totalorder %v2152_v19, 2  ;;  %vm552_vm6 = vc.u32 %v544_v6, %v548_v4 }
  0x78   : > { %v314_v0 = vmul.f32 %v313_v62, %v311_v43  ;;  %v321_v8 = vmul.f32 %v320_v63, %v311_v43  ;;  %v569_v18 = vmul.u32 %v565_v23, %v541_v38  ;;  %vm326_vm7 = vweird.f32 %v1926_v17 }
  0x79   : > { %vm2185_vm8 = vcmp.le.f32.partialorder %v337_v25, 0.7853982  ;;  %v450_v31 = vor.u32 %v449_v13, %v448_v40  ;;  %v453_v33 = vshll.u32 %v452_v16, 23  ;;  %v553_v21 = vsel %vm552_vm6, 1, %v1841_v3 }
  0x7a   : > { %v315_v30 = vadd.f32 -0.4999988, %v314_v0  ;;  %v322_v14 = vadd.f32 -0.16666654, %v321_v8  ;;  %v554_v37 = vadd.s32 %v548_v4, %v544_v6  ;;  %v555_v15 = vadd.s32 %v553_v21, %v547_v12 }
  0x7b   : > { %v570_v41 = vshll.u32 %v2174_v28, 16  ;;  %v454_v20 = vor.u32 4788187, %v453_v33  ;;  %v457_v38 = vcvt.s32.f32 %v450_v31  ;;  %v551_v47 = vshrl.u32 %v2166_v32, 16 }
  0x7c   : > { %v316_v36 = vmul.f32 %v315_v30, %v311_v43  ;;  %v323_v5 = vmul.f32 %v322_v14, %v311_v43  ;;  %vm556_vm9 = vc.u32 %v554_v37, %v550_v29  ;;  %v572_v54 = vshll.u32 %v2172_v26, 16 }
  0x7d   : > { %v557_v42 = vsel %vm556_vm9, 1, %v1841_v3  ;;  %v455_v55 = vand.u32 2147483647, %v454_v20  ;;  %v571_v43 = vshrl.u32 %v2174_v28, 16  ;;  %vm574_vm10 = vc.u32 %v566_v60, %v570_v41 }
  0x7e   : > { %v317_v25 = vadd.f32 1.0, %v316_v36  ;;  %v324_v49 = vadd.f32 1.0, %v323_v5  ;;  %v559_v23 = vadd.s32 %v557_v42, %v555_v15  ;;  %v575_v32 = vsel %vm574_vm10, 1, %v1841_v3 }
  0x7f   : > { %v576_v63 = vadd.s32 %v570_v41, %v566_v60  ;;  %v458_v58 = vmul.f32 %v457_v38, %v455_v55  ;;  %v577_v51 = vadd.s32 %v575_v32, %v569_v18  ;;  %v159_v40 = vadd.s32 24, %v1912_v2 }
  0x80   : > { %v325_v6 = vmul.f32 %v324_v49, %v2142_v39  ;;  %v333_v62 = vxor.u32 2147483648, %v317_v25  ;;  %v560_v4 = vadd.s32 %v559_v23, %v549_v24  ;;  %v573_v60 = vshrl.u32 %v2172_v26, 16 }
  0x81   : > { %vm578_vm11 = vc.u32 %v576_v63, %v572_v54  ;;  %v459_v12 = vxor.u32 2147483648, %v458_v58  ;;  %v164_v24 = vadd.s32 %v1910_v1, %v159_v40  ;;  %v2221_v14 = vadd.s32 %v576_v63, %v572_v54 }
  0x82   : > { %v330_v57 = vxor.u32 2147483648, %v325_v6  ;;  %v334_v0 = vsel %vm332_vm0, %v333_v62, %v325_v6  ;;  %v951_v8 = vsel %vm949_vm1, %v333_v62, %v325_v6  ;;  %v2206_v39 = vadd.s32 %v560_v4, %v551_v47 }
  0x83   : > { %v579_v28 = vsel %vm578_vm11, 1, %v1841_v3  ;;  %v460_v26 = vsel %vm339_vm12, %v459_v12, %v458_v58  ;;  %v530_v45 = vsel %vm524_vm13, %v2156_v35, %v2160_v53  ;;  %v464_v21 = vsel %vm2185_vm8, 0, %v2164_v56 }
  0x84   : > { %v331_v13 = vsel %vm329_vm2, %v317_v25, %v330_v57  ;;  %v948_v2 = vsel %vm946_vm3, %v317_v25, %v330_v57  ;;  %v581_v16 = vadd.s32 %v579_v28, %v577_v51  ;;  %v463_v1 = vsel %vm2185_vm8, %v1933_v22, %v460_v26 }
  0x85   : > { %v335_v29 = vsel %vm328_vm4, %v331_v13, %v334_v0  ;;  %v952_v30 = vsel %vm945_vm5, %v948_v2, %v951_v8  ;;  %v465_v33 = vmul.f32 %v463_v1, %v463_v1  ;;  %v168_v36 = vmul.u32 2, %v164_v24 }
  0x86   : > { %v2225_v18 = vsel %vm326_vm7, nan, %v335_v29  ;;  %v582_v19 = vadd.s32 %v581_v16, %v571_v43  ;;  %v2236_v31 = vsel %vm326_vm7, nan, %v952_v30  ;;  %v584_v35 = vmul.u32 %v2104_v61, %v530_v45 }
  0x87   : > { %1445 = vst [vmem:[%s2240_s29] sm:$0xff] %v2225_v18  ;;  %v466_v17 = vmul.f32 -0.001358992, %v465_v33  ;;  %v473_v34 = vmul.f32 -0.00019511016, %v465_v33  ;;  %vm586_vm12 = vc.u32 %v2206_v39, %v2221_v14  ;;  %v172_v5 = vcvt.s32.f32 %v168_v36 }
  0x88   : > { %v583_v37 = vadd.s32 %v582_v19, %v573_v60  ;;  %1453 = vst [vmem:[%s2249_s30] sm:$0xff] %v2236_v31  ;;  %v1098_v56 = vadd.s32 3, %v464_v21  ;;  %v481_v55 = vand.u32 3, %v464_v21  ;;  %vm480_vm4 = vweird.f32 %v1933_v22 }
  0x89   : > { %v467_v15 = vadd.f32 0.041655596, %v466_v17  ;;  %v474_v9 = vadd.f32 0.008332121, %v473_v34  ;;  %v177_v20 = vadd.f32 %v1920_v10, %v172_v5  ;;  %vm2276_vm6 = vcmp.le.f32.partialorder %v491_v7, 0.7853982 }
  0x8a   : > { %v587_v53 = vadd.s32 1, %v583_v37  ;;  %v1099_v23 = vand.u32 3, %v1098_v56  ;;  %vm482_vm13 = vcmp.lt.s32.totalorder %v481_v55, 2  ;;  %vm486_vm14 = vcmp.eq.s32.totalorder %v481_v55, 2 }
  0x8b   : > { %v468_v38 = vmul.f32 %v467_v15, %v465_v33  ;;  %v475_v47 = vmul.f32 %v474_v9, %v465_v33  ;;  %v2258_v49 = vmul.f32 %v1922_v11, %v177_v20  ;;  %vm483_vm0 = vcmp.eq.s32.totalorder %v481_v55, 0 }
  0x8c   : > { %v588_v41 = vsel %vm586_vm12, %v587_v53, %v583_v37  ;;  %vm1104_vm15 = vcmp.eq.s32.totalorder %v1099_v23, 2  ;;  %vm1100_vm1 = vcmp.lt.s32.totalorder %v1099_v23, 2  ;;  %vm1101_vm2 = vcmp.eq.s32.totalorder %v1099_v23, 0 }
  0x8d   : > { %v589_v25 = vadd.s32 %v588_v41, %v584_v35  ;;  %v469_v42 = vadd.f32 -0.4999988, %v468_v38  ;;  %v476_v54 = vadd.f32 -0.16666654, %v475_v47  ;;  %v648_v43 = vand.u32 2139095040, %v2258_v49 }
  0x8e   : > { %v645_v0 = vand.u32 2147483647, %v2258_v49  ;;  %vm493_vm7 = vcmp.lt.s32.totalorder %v1940_v27, 0  ;;  %v585_v35 = vadd.s32 %v2221_v14, %v2206_v39 }
  0x8f   : > { %v590_v61 = vadd.s32 536870912, %v589_v25  ;;  %v470_v6 = vmul.f32 %v469_v42, %v465_v33  ;;  %v477_v62 = vmul.f32 %v476_v54, %v465_v33  ;;  %v649_v63 = vshrl.u32 %v648_v43, 23 }
  0x91   : > { %v591_v32 = vshrl.u32 %v590_v61, 30  ;;  %v471_v58 = vadd.f32 1.0, %v470_v6  ;;  %v478_v4 = vadd.f32 1.0, %v477_v62  ;;  %v1611_v51 = vadd.s32 4294967169, %v649_v63 }
  0x93   : > { %v592_v10 = vshll.u32 %v591_v32, 30  ;;  %v479_v11 = vmul.f32 %v478_v4, %v463_v1  ;;  %v487_v40 = vxor.u32 2147483648, %v471_v58  ;;  %v655_v8 = vadd.s32 1, %v1611_v51 }
  0x94   : > { %v652_v1 = vand.u32 8388607, %v645_v0  ;;  %v615_v33 = vsub.s32 4, %v591_v32 }
  0x95   : > { %v593_v57 = vsub.s32 %v589_v25, %v592_v10  ;;  %v484_v12 = vxor.u32 2147483648, %v479_v11  ;;  %v488_v60 = vsel %vm486_vm14, %v487_v40, %v479_v11  ;;  %v1106_v28 = vsel %vm1104_vm15, %v487_v40, %v479_v11 }
  0x96   : > { %vm656_vm5 = vcmp.gt.s32.totalorder %v655_v8, 0  ;;  %v653_v34 = vor.u32 8388608, %v652_v1  ;;  %v616_v53 = vsel %vm493_vm7, %v615_v33, %v591_v32 }
  0x97   : > { %vm594_vm3 = vcmp.lt.s32.totalorder %v593_v57, 0  ;;  %v595_v13 = vsub.s32 0, %v593_v57  ;;  %v485_v2 = vsel %vm483_vm0, %v471_v58, %v484_v12  ;;  %v1103_v16 = vsel %vm1101_vm2, %v471_v58, %v484_v12 }
  0x98   : > { %v657_v24 = vsel %vm656_vm5, %v655_v8, 0  ;;  %v489_v29 = vsel %vm482_vm13, %v485_v2, %v488_v60  ;;  %v1107_v30 = vsel %vm1100_vm1, %v1103_v16, %v1106_v28  ;;  %v2293_v39 = vsel %vm2276_vm6, 0, %v616_v53 }
  0x99   : > { %v596_v26 = vsel %vm594_vm3, %v595_v13, %v593_v57  ;;  %v2266_v45 = vsel %vm480_vm4, nan, %v489_v29  ;;  %v659_v21 = vand.u32 31, %v657_v24  ;;  %v2268_v37 = vsel %vm480_vm4, nan, %v1107_v30 }
  0x9a   : > { %v597_v19 = vclz %v596_v26  ;;  %1446 = vst [vmem:[%s2240_s29 + $0x8] sm:$0xff] %v2266_v45  ;;  %v2289_v47 = vshrl.u32 %v657_v24, 5  ;;  %v2297_v42 = vshll.u32 %v653_v34, 8 }
  0x9b   : > { %v660_v36 = vsub.s32 32, %v659_v21  ;;  %1454 = vst [vmem:[%s2249_s30 + $0x8] sm:$0xff] %v2268_v37  ;;  %v662_v5 = vshll.u32 %v1835_v44, %v659_v21  ;;  %v665_v7 = vshll.u32 %v1836_v46, %v659_v21  ;;  %v668_v14 = vshll.u32 %v1837_v48, %v659_v21 }
  0x9c   : > { %v1609_v22 = vadd.s32 4294967294, %v597_v19  ;;  %v671_v25 = vshll.u32 %v1838_v50, %v659_v21  ;;  %v674_v55 = vshll.u32 %v1839_v52, %v659_v21  ;;  %vm677_vm9 = vcmp.lt.s32.totalorder %v2289_v47, 1 }
  0x9d   : > { %v663_v9 = vshrl.u32 %v1836_v46, %v660_v36  ;;  %v666_v56 = vshrl.u32 %v1837_v48, %v660_v36  ;;  %v669_v43 = vshrl.u32 %v1838_v50, %v660_v36  ;;  %v672_v6 = vshrl.u32 %v1839_v52, %v660_v36 }
  0x9e   : > { %vm1610_vm8 = vcmp.lt.s32.totalorder %v1609_v22, 0  ;;  %v675_v62 = vshrl.u32 %v1840_v59, %v660_v36  ;;  %vm680_vm10 = vcmp.lt.s32.totalorder %v2289_v47, 4  ;;  %vm679_vm11 = vcmp.lt.s32.totalorder %v2289_v47, 3 }
  0x9f   : > { %v600_v15 = vsel %vm1610_vm8, 0, %v1609_v22  ;;  %v664_v46 = vor.u32 %v663_v9, %v662_v5  ;;  %v667_v23 = vor.u32 %v666_v56, %v665_v7  ;;  %v670_v48 = vor.u32 %v669_v43, %v668_v14 }
  0xa0   : > { %v601_v41 = vsub.s32 32, %v600_v15  ;;  %v602_v20 = vshll.u32 %v593_v57, %v600_v15  ;;  %v605_v38 = vsub.s32 4294967266, %v600_v15  ;;  %v673_v58 = vor.u32 %v672_v6, %v671_v25 }
  0xa1   : > { %v694_v4 = vand.u32 65535, %v2297_v42  ;;  %v676_v11 = vor.u32 %v675_v62, %v674_v55  ;;  %vm678_vm12 = vcmp.lt.s32.totalorder %v2289_v47, 2  ;;  %v685_v50 = vsel %vm677_vm9, %v664_v46, %v667_v23 }
  0xa2   : > { %v603_v54 = vshrl.u32 %v585_v35, %v601_v41  ;;  %v606_v61 = vadd.s32 127, %v605_v38  ;;  %v686_v52 = vsel %vm680_vm10, %v673_v58, 920167782  ;;  %v689_v59 = vsel %vm677_vm9, %v667_v23, %v670_v48 }
  0xa3   : > { %v695_v40 = vshrl.u32 %v2297_v42, 16  ;;  %v661_v8 = vshrl.u32 %v1835_v44, %v660_v36  ;;  %v687_v12 = vsel %vm679_vm11, %v670_v48, %v686_v52  ;;  %v690_v60 = vsel %vm680_vm10, %v676_v11, 1326507024 }
  0xa4   : > { %v604_v32 = vor.u32 %v603_v54, %v602_v20  ;;  %v607_v63 = vshll.u32 %v606_v61, 23  ;;  %v688_v28 = vsel %vm678_vm12, %v685_v50, %v687_v12  ;;  %v691_v13 = vsel %vm679_vm11, %v673_v58, %v690_v60 }
  0xa5   : > { %v692_v16 = vsel %vm678_vm12, %v689_v59, %v691_v13  ;;  %v718_v24 = vand.u32 65535, %v688_v28  ;;  %v719_v29 = vshrl.u32 %v688_v28, 16  ;;  %v1253_v44 = vadd.s32 3, %v2293_v39 }
  0xa6   : > { %v608_v10 = vor.u32 4788187, %v607_v63  ;;  %v611_v51 = vcvt.s32.f32 %v604_v32  ;;  %v682_v30 = vsel %vm680_vm10, %v670_v48, 2102212464  ;;  %v696_v26 = vand.u32 65535, %v692_v16 }
  0xa7   : > { %v697_v1 = vshrl.u32 %v692_v16, 16  ;;  %v681_v33 = vsel %vm677_vm9, %v661_v8, %v664_v46  ;;  %v721_v21 = vmul.u32 %v719_v29, %v694_v4  ;;  %v722_v22 = vmul.u32 %v718_v24, %v695_v40 }
  0xa8   : > { %v609_v57 = vand.u32 2147483647, %v608_v10  ;;  %v698_v36 = vmul.u32 %v696_v26, %v694_v4  ;;  %v700_v35 = vmul.u32 %v696_v26, %v695_v40  ;;  %v720_v53 = vmul.u32 %v718_v24, %v694_v4 }
  0xa9   : > { %v699_v34 = vmul.u32 %v697_v1, %v694_v4  ;;  %v683_v15 = vsel %vm679_vm11, %v667_v23, %v682_v30  ;;  %v701_v9 = vmul.u32 %v697_v1, %v695_v40  ;;  %v724_v7 = vshll.u32 %v721_v21, 16 }
  0xaa   : > { %v612_v2 = vmul.f32 %v611_v51, %v609_v57  ;;  %v704_v20 = vshll.u32 %v700_v35, 16  ;;  %v723_v38 = vmul.u32 %v719_v29, %v695_v40  ;;  %v725_v54 = vshrl.u32 %v721_v21, 16 }
  0xab   : > { %v702_v41 = vshll.u32 %v699_v34, 16  ;;  %v703_v25 = vshrl.u32 %v699_v34, 16  ;;  %v726_v61 = vshll.u32 %v722_v22, 16  ;;  %vm728_vm14 = vc.u32 %v720_v53, %v724_v7 }
  0xac   : > { %v613_v19 = vxor.u32 2147483648, %v612_v2  ;;  %v730_v55 = vadd.s32 %v724_v7, %v720_v53  ;;  %v729_v62 = vsel %vm728_vm14, 1, %v1841_v3  ;;  %v705_v10 = vshrl.u32 %v700_v35, 16 }
  0xad   : > { %vm706_vm13 = vc.u32 %v698_v36, %v702_v41  ;;  %v708_v46 = vadd.s32 %v702_v41, %v698_v36  ;;  %v731_v17 = vadd.s32 %v729_v62, %v723_v38  ;;  %v727_v11 = vshrl.u32 %v722_v22, 16 }
  0xae   : > { %v614_v5 = vsel %vm493_vm7, %v613_v19, %v612_v2  ;;  %v707_v23 = vsel %vm706_vm13, 1, %v1841_v3  ;;  %vm732_vm0 = vc.u32 %v730_v55, %v726_v61  ;;  %v684_v40 = vsel %vm678_vm12, %v681_v33, %v683_v15 }
  0xaf   : > { %v617_v56 = vsel %vm2276_vm6, %v1940_v27, %v614_v5  ;;  %v709_v32 = vadd.s32 %v707_v23, %v701_v9  ;;  %vm710_vm15 = vc.u32 %v708_v46, %v704_v20  ;;  %v733_v4 = vsel %vm732_vm0, 1, %v1841_v3 }
  0xb0   : > { %v619_v14 = vmul.f32 %v617_v56, %v617_v56  ;;  %v711_v58 = vsel %vm710_vm15, 1, %v1841_v3  ;;  %v735_v50 = vadd.s32 %v733_v4, %v731_v17  ;;  %v734_v8 = vadd.s32 %v730_v55, %v726_v61  ;;  %v2349_v61 = vld [vmem:[#allocation2 + $0x2] ss:$0 sm:$0xff] }
  0xb1   : > { %v713_v51 = vadd.s32 %v711_v58, %v709_v32  ;;  %v635_v13 = vand.u32 3, %v2293_v39  ;;  %v1254_v2 = vand.u32 3, %v1253_v44  ;;  %v738_v30 = vmul.u32 %v2297_v42, %v684_v40 }
  0xb2   : > { %v620_v43 = vmul.f32 -0.001358992, %v619_v14  ;;  %v627_v6 = vmul.f32 -0.00019511016, %v619_v14  ;;  %v736_v12 = vadd.s32 %v735_v50, %v725_v54  ;;  %vm634_vm8 = vweird.f32 %v1940_v27  ;;  %v2351_v27 = vld [vmem:[#allocation2 + $0x3] ss:$0 sm:$0xff] }
  0xb3   : > { %v714_v57 = vadd.s32 %v713_v51, %v703_v25  ;;  %vm640_vm2 = vcmp.eq.s32.totalorder %v635_v13, 2  ;;  %vm1259_vm3 = vcmp.eq.s32.totalorder %v1254_v2, 2  ;;  %vm636_vm4 = vcmp.lt.s32.totalorder %v635_v13, 2 }
  0xb4   : > { %v621_v63 = vadd.f32 0.041655596, %v620_v43  ;;  %v628_v48 = vadd.f32 0.008332121, %v627_v6  ;;  %v737_v24 = vadd.s32 %v736_v12, %v727_v11  ;;  %vm637_vm5 = vcmp.eq.s32.totalorder %v635_v13, 0 }
  0xb5   : > { %v715_v16 = vadd.s32 %v714_v57, %v705_v10  ;;  %vm1255_vm6 = vcmp.lt.s32.totalorder %v1254_v2, 2  ;;  %vm1256_vm7 = vcmp.eq.s32.totalorder %v1254_v2, 0  ;;  %v1420_v32 = vmul.f32 %v2349_v61, %v2225_v18 }
  0xb6   : > { %v622_v52 = vmul.f32 %v621_v63, %v619_v14  ;;  %v629_v59 = vmul.f32 %v628_v48, %v619_v14  ;;  %v741_v26 = vadd.s32 1, %v737_v24  ;;  %v1437_v17 = vmul.f32 %v2351_v27, %v2225_v18 }
  0xb7   : > { %vm740_vm1 = vc.u32 %v715_v16, %v734_v8  ;;  %v739_v54 = vadd.s32 %v734_v8, %v715_v16  ;;  %v1421_v63 = vmul.f32 %v2349_v61, %v2266_v45  ;;  %v1438_v58 = vmul.f32 %v2351_v27, %v2266_v45 }
  0xb8   : > { %v623_v60 = vadd.f32 -0.4999988, %v622_v52  ;;  %v630_v28 = vadd.f32 -0.16666654, %v629_v59  ;;  %v742_v47 = vsel %vm740_vm1, %v741_v26, %v737_v24  ;;  %v1425_v11 = vmul.f32 %v2351_v27, %v2236_v31 }
  0xb9   : > { %v743_v22 = vadd.s32 %v742_v47, %v738_v30  ;;  %v1426_v18 = vmul.f32 %v2351_v27, %v2268_v37  ;;  %v1433_v52 = vmul.f32 %v2349_v61, %v2236_v31  ;;  %v1434_v40 = vmul.f32 %v2349_v61, %v2268_v37 }
  0xba   : > { %v624_v3 = vmul.f32 %v623_v60, %v619_v14  ;;  %v631_v29 = vmul.f32 %v630_v28, %v619_v14  ;;  %v1429_v8 = vsub.f32 %v1420_v32, %v1425_v11  ;;  %vm647_vm11 = vcmp.lt.s32.totalorder %v2258_v49, 0 }
  0xbb   : > { %v744_v42 = vadd.s32 536870912, %v743_v22  ;;  %v1430_v12 = vsub.f32 %v1421_v63, %v1426_v18  ;;  %v1441_v13 = vadd.f32 %v1437_v17, %v1433_v52  ;;  %v1442_v2 = vadd.f32 %v1438_v58, %v1434_v40 }
  0xbc   : > { %v625_v1 = vadd.f32 1.0, %v624_v3  ;;  %v632_v19 = vadd.f32 1.0, %v631_v29  ;;  %1449 = vst [vmem:[%s2240_s29 + $0x20] sm:$0xff] %v1429_v8  ;;  %vm646_vm12 = vcmp.le.f32.partialorder %v645_v0, 0.7853982 }
  0xbd   : > { %v745_v53 = vshrl.u32 %v744_v42, 30  ;;  %1450 = vst [vmem:[%s2240_s29 + $0x28] sm:$0xff] %v1430_v12 }
  0xbe   : > { %v633_v33 = vmul.f32 %v632_v19, %v617_v56  ;;  %v641_v21 = vxor.u32 2147483648, %v625_v1  ;;  %1457 = vst [vmem:[%s2249_s30 + $0x20] sm:$0xff] %v1441_v13 }
  0xbf   : > { %v746_v7 = vshll.u32 %v745_v53, 30  ;;  %v769_v24 = vsub.s32 4, %v745_v53  ;;  %1458 = vst [vmem:[%s2249_s30 + $0x28] sm:$0xff] %v1442_v2 }
  0xc0   : > { %v638_v39 = vxor.u32 2147483648, %v633_v33  ;;  %v642_v44 = vsel %vm640_vm2, %v641_v21, %v633_v33  ;;  %v1261_v36 = vsel %vm1259_vm3, %v641_v21, %v633_v33  ;;  %vm788_vm3 = vweird.f32 %v2258_v49 }
  0xc1   : > { %v747_v41 = vsub.s32 %v743_v22, %v746_v7  ;;  %v770_v29 = vsel %vm647_vm11, %v769_v24, %v745_v53 }
  0xc2   : > { %v639_v34 = vsel %vm637_vm5, %v625_v1, %v638_v39  ;;  %v1258_v35 = vsel %vm1256_vm7, %v625_v1, %v638_v39  ;;  %v772_v1 = vsel %vm646_vm12, 0, %v770_v29 }
  0xc3   : > { %v643_v5 = vsel %vm636_vm4, %v639_v34, %v642_v44  ;;  %v1262_v15 = vsel %vm1255_vm6, %v1258_v35, %v1261_v36  ;;  %vm748_vm9 = vcmp.lt.s32.totalorder %v747_v41, 0  ;;  %v749_v20 = vsub.s32 0, %v747_v41 }
  0xc4   : > { %v644_v9 = vsel %vm634_vm8, nan, %v643_v5  ;;  %v1263_v56 = vsel %vm634_vm8, nan, %v1262_v15  ;;  %v1408_v22 = vadd.s32 3, %v772_v1  ;;  %v789_v0 = vand.u32 3, %v772_v1 }
  0xc5   : > { %1447 = vst [vmem:[%s2240_s29 + $0x10] sm:$0xff] %v644_v9  ;;  %v750_v38 = vsel %vm748_vm9, %v749_v20, %v747_v41  ;;  %v1422_v48 = vmul.f32 %v2349_v61, %v644_v9  ;;  %v1439_v4 = vmul.f32 %v2351_v27, %v644_v9  ;;  %v1427_v50 = vmul.f32 %v2351_v27, %v1263_v56 }
  0xc6   : > { %1455 = vst [vmem:[%s2249_s30 + $0x10] sm:$0xff] %v1263_v56  ;;  %v751_v14 = vclz %v750_v38  ;;  %v1435_v57 = vmul.f32 %v2349_v61, %v1263_v56  ;;  %v1409_v34 = vand.u32 3, %v1408_v22  ;;  %vm794_vm13 = vcmp.eq.s32.totalorder %v789_v0, 2 }
  0xc7   : > { %v1431_v60 = vsub.f32 %v1422_v48, %v1427_v50  ;;  %vm790_vm15 = vcmp.lt.s32.totalorder %v789_v0, 2  ;;  %vm791_vm0 = vcmp.eq.s32.totalorder %v789_v0, 0 }
  0xc8   : > { %v1612_v25 = vadd.s32 4294967294, %v751_v14  ;;  %v1443_v31 = vadd.f32 %v1439_v4, %v1435_v57  ;;  %vm1414_vm14 = vcmp.eq.s32.totalorder %v1409_v34, 2  ;;  %vm1411_vm1 = vcmp.eq.s32.totalorder %v1409_v34, 0 }
  0xc9   : > { %1451 = vst [vmem:[%s2240_s29 + $0x30] sm:$0xff] %v1431_v60  ;;  %vm1410_vm2 = vcmp.lt.s32.totalorder %v1409_v34, 2 }
  0xca   : > { %vm1613_vm10 = vcmp.lt.s32.totalorder %v1612_v25, 0  ;;  %1459 = vst [vmem:[%s2249_s30 + $0x30] sm:$0xff] %v1443_v31 }
  0xcb   : > { %v754_v46 = vsel %vm1613_vm10, 0, %v1612_v25 }
  0xcc   : > { %v755_v55 = vsub.s32 32, %v754_v46  ;;  %v756_v43 = vshll.u32 %v747_v41, %v754_v46  ;;  %v759_v6 = vsub.s32 4294967266, %v754_v46 }
  0xce   : > { %v757_v23 = vshrl.u32 %v739_v54, %v755_v55  ;;  %v760_v62 = vadd.s32 127, %v759_v6 }
  0xd0   : > { %v758_v10 = vor.u32 %v757_v23, %v756_v43  ;;  %v761_v51 = vshll.u32 %v760_v62, 23 }
  0xd2   : > { %v762_v59 = vor.u32 4788187, %v761_v51  ;;  %v765_v45 = vcvt.s32.f32 %v758_v10 }
  0xd4   : > { %v763_v28 = vand.u32 2147483647, %v762_v59 }
  0xd6   : > { %v766_v16 = vmul.f32 %v765_v45, %v763_v28 }
  0xd8   : > { %v767_v37 = vxor.u32 2147483648, %v766_v16 }
  0xda   : > { %v768_v3 = vsel %vm647_vm11, %v767_v37, %v766_v16 }
  0xdb   : > { %v771_v30 = vsel %vm646_vm12, %v2258_v49, %v768_v3 }
  0xdc   : > { %v773_v26 = vmul.f32 %v771_v30, %v771_v30 }
  0xde   : > { %v774_v19 = vmul.f32 -0.001358992, %v773_v26  ;;  %v781_v47 = vmul.f32 -0.00019511016, %v773_v26 }
  0xe0   : > { %v775_v33 = vadd.f32 0.041655596, %v774_v19  ;;  %v782_v21 = vadd.f32 0.008332121, %v781_v47 }
  0xe2   : > { %v776_v39 = vmul.f32 %v775_v33, %v773_v26  ;;  %v783_v44 = vmul.f32 %v782_v21, %v773_v26 }
  0xe4   : > { %v777_v36 = vadd.f32 -0.4999988, %v776_v39  ;;  %v784_v42 = vadd.f32 -0.16666654, %v783_v44 }
  0xe6   : > { %v778_v35 = vmul.f32 %v777_v36, %v773_v26  ;;  %v785_v5 = vmul.f32 %v784_v42, %v773_v26 }
  0xe8   : > { %v779_v15 = vadd.f32 1.0, %v778_v35  ;;  %v786_v53 = vadd.f32 1.0, %v785_v5 }
  0xea   : > { %v787_v9 = vmul.f32 %v786_v53, %v771_v30  ;;  %v795_v7 = vxor.u32 2147483648, %v779_v15 }
  0xec   : > { %v792_v56 = vxor.u32 2147483648, %v787_v9  ;;  %v796_v41 = vsel %vm794_vm13, %v795_v7, %v787_v9  ;;  %v1416_v20 = vsel %vm1414_vm14, %v795_v7, %v787_v9 }
  0xee   : > { %v793_v38 = vsel %vm791_vm0, %v779_v15, %v792_v56  ;;  %v1413_v14 = vsel %vm1411_vm1, %v779_v15, %v792_v56 }
  0xef   : > { %v797_v25 = vsel %vm790_vm15, %v793_v38, %v796_v41  ;;  %v1417_v54 = vsel %vm1410_vm2, %v1413_v14, %v1416_v20 }
  0xf0   : > { %v798_v46 = vsel %vm788_vm3, nan, %v797_v25  ;;  %v1418_v55 = vsel %vm788_vm3, nan, %v1417_v54 }
  0xf1   : > { %v1423_v49 = vmul.f32 %v2349_v61, %v798_v46  ;;  %v1440_v43 = vmul.f32 %v2351_v27, %v798_v46  ;;  %1448 = vst [vmem:[%s2240_s29 + $0x18] sm:$0xff] %v798_v46  ;;  %v1428_v6 = vmul.f32 %v2351_v27, %v1418_v55  ;;  %v1436_v23 = vmul.f32 %v2349_v61, %v1418_v55 }
  0xf2   : > { %1456 = vst [vmem:[%s2249_s30 + $0x18] sm:$0xff] %v1418_v55 }
  0xf3   : > { %v1432_v62 = vsub.f32 %v1423_v49, %v1428_v6  ;;  %v1444_v32 = vadd.f32 %v1440_v43, %v1436_v23 }
  0xf5   : > { %1452 = vst [vmem:[%s2240_s29 + $0x38] sm:$0xff] %v1432_v62 }
  0xf6   : > { %1460 = vst [vmem:[%s2249_s30 + $0x38] sm:$0xff] %v1444_v32 }
  0xf7   : > { %1761 = shalt.err (!%p1758_p7)
}
  0xf8   : > { %s1842_s29 = smov 128   ;;  %s1843_s30 = smov 8  }
  0xf9   : > { %1640 = dma.vmem_to_hbm [thread:$0]  (%p1894_p5), %s1480_s13, 1024, %s1482_s14, %s1462_s21, %s1842_s29, %s1842_s29, %s1843_s30  }
  0xfa   : > { %s1467_s4 = scalar_lea.sflag [#allocation7], %s2193_s27  ;;  %s1776_s5 = sshra.s32 %s1499_s16, 4  ;;  %s1777_s5 = int_to_ptr.hbm [resolvable:$true] %s1776_s5 }
  0xfb   : > { %s1778_s6 = scalar_lea.hbm %s1777_s5, 64  ;;  %s1782_s22 = scalar_lea.hbm %s2456_s2, 128 }
  0xfc   : > { %p1779_p8 = scmp.ne.s32.totalorder %s1777_s5, %s1778_s6  ;;  %p1783_p11 = scmp.lt.s32.totalorder %s1777_s5, %s2456_s2 }
  0xfd   : > { %p1784_p12 = scmp.lt.s32.totalorder %s1782_s22, %s1778_s6 }
  0xfe   : > { %p1780_p9 = pnand %p1779_p8, %p1894_p5 }
  0xff   : > { %p1785_p13 = por %p1784_p12, %p1783_p11 }
 0x100   : > { %p1781_p10 = pneg %p1780_p9 }
 0x102   : > { %p1786_p0 = pnand %p1785_p13, %p1781_p10 }
 0x104   : > { %1789 = shalt.err (!%p1786_p0)
}
 0x105   : > { %1641 = dma.vmem_to_hbm [thread:$0]  (%p1894_p5), %s2407_s17, 1024, %s1499_s16, %s1467_s4, %s1842_s29, %s1842_s29, %s1843_s30  }
 0x106 PF: > { %p1657_p1 = scmp.ge.s32.totalorder %s1832_s12, 2  ;;  %s1513_s27 = sand.u32 1, %s1820_s9  }
 0x107   : > { %s1514_s13 = scalar_lea.sflag [#allocation4], %s1513_s27 }
 0x108   : > { %p1649_p2 = pnand %p1657_p1, %p1898_p6 }
 0x10a   : > { %p1650_p3 = pneg %p1649_p2 }
 0x10c   : > { %1811 = dma.done.wait (%p1650_p3), %s1514_s13, 1024  }
 0x10d   : > { %1813 = vsyncadd (%p1650_p3), %s1514_s13, 4294966272  ;;  %s1524_s14 = scalar_lea.sflag [#allocation7], %s1513_s27 }
 0x10e   : > { %1815 = dma.done.wait (%p1650_p3), %s1524_s14, 1024  }
 0x10f   : > { %1817 = vsyncadd (%p1650_p3), %s1524_s14, 4294966272  ;;  %p17_p5 = scmp.ge.s32.totalorder %s1882_s15, 4   ;;  %s2465_s9 = smov %s1824_s10 }
 0x110   : > { %s2466_s10 = smov %s1828_s11  ;;  %s2467_s11 = smov %s1892_s18 }
 0x111   : > { %s2468_s12 = smov %s1882_s15  ;;  %19 = sbr.rel (!%p17_p5) target bundleno = 6 (0x6), region = 78 }
 0x116   :  { %1530 = vsyncpa [#allocation3], 1 }
 0x117   :  { %1532 = vsyncpa [#allocation3 + $0x1], 1 }
 0x118   :  { %1533 = vsyncpa [#allocation4], 1 }
 0x119   :  { %1535 = vsyncpa [#allocation4 + $0x1], 1 }
 0x11a   :  { %1536 = vsyncpa [#allocation7], 1 }
 0x11b   :  { %1538 = vsyncpa [#allocation7 + $0x1], 1 }

</bundles_post_ra>
